<compile_context>
chip_gen: v7x
topology: tpu7x:2x2x1
jax: 0.10.0
libtpu: 0.0.40
codegen_flags: <defaults>
</compile_context>

<pallas_src>
import jax
import jax.numpy as jnp
import numpy as np
from jax.experimental import pallas as pl
from jax.experimental.pallas import tpu as pltpu

# ----------------------------- configuration --------------------------------
B = 2                 # batch
IN_FEATURES = 512     # resnet18 fc.in_features
H = W = 4             # spatial size of the last backbone feature map
HID1 = 512            # hidden_dim1 for resnet18
HID2 = 256            # hidden_dim2 for resnet18
NUM_CLASSES = 20
BIN_HID = 256         # hidden dim of each binary head
BIN_TOTAL = NUM_CLASSES * BIN_HID    # 5120 columns of the concatenated w1
OUT_PAD = 128                        # lane-dense logits / probs slab width

_VMEM = pl.BlockSpec(memory_space=pltpu.MemorySpace.VMEM)
_SMEM = pl.BlockSpec(memory_space=pltpu.MemorySpace.SMEM)


# ------------------------------- kernels -------------------------------------
def multiclass_kernel(feats_ref, w1_ref, b1_ref, w2_ref, b2_ref,
                      w3_ref, b3_ref, o_ref):
    # feats: (B, 512) bf16; weights bf16; biases f32; o: (B, 128) lane-dense.
    h = jnp.dot(feats_ref[...], w1_ref[...], preferred_element_type=jnp.float32)
    h = jnp.maximum(h + b1_ref[...], 0.0)                              # (B, HID1)
    h = jnp.dot(h.astype(jnp.bfloat16), w2_ref[...],
                preferred_element_type=jnp.float32)
    h = jnp.maximum(h + b2_ref[...], 0.0)                              # (B, HID2)
    o_ref[...] = jnp.dot(h.astype(jnp.bfloat16), w3_ref[...],
                         preferred_element_type=jnp.float32) + b3_ref[...]


def binary_group_kernel(feats_ref, w1_ref, b1_ref, w2_ref, b2_ref, o_ref):
    # One group of binary heads.  First layer: a single lane-dense
    # (B,512)@(512,GW) MXU matmul.  Second layer: VPU elementwise multiply by
    # the flattened per-head weights + per-head lane reduce (static unroll over
    # aligned 256-lane segments), sigmoids written into a (B, 128) padded slab.
    bsz = feats_ref.shape[0]
    hpg = b2_ref.shape[2]                                  # heads in this group
    h = jnp.dot(feats_ref[...], w1_ref[...], preferred_element_type=jnp.float32)
    h = jnp.maximum(h + b1_ref[...], 0.0)                              # (B, GW)
    z = h * w2_ref[...].astype(jnp.float32)                            # (B, GW)
    o_ref[0] = jnp.zeros((bsz, OUT_PAD), jnp.float32)   # dense 128-lane store
    b2 = b2_ref[0]                                                     # (1, hpg)
    for n in range(hpg):                                 # static unroll (<= 20)
        seg = z[:, n * BIN_HID:(n + 1) * BIN_HID]        # aligned (B, 256) slice
        y = jnp.sum(seg, axis=-1, keepdims=True) + b2[:, n:n + 1]      # (B, 1)
        o_ref[0, :, n:n + 1] = jax.nn.sigmoid(y)


def binary_one_kernel(idx_ref, feats_ref, w1_ref, b1_ref, w2_ref, b2_ref, o_ref):
    # Single binary head: only this head's (512,256) weight block was streamed
    # (scalar-prefetched head index drives the BlockSpec index_map).
    h = jnp.dot(feats_ref[...], w1_ref[...], preferred_element_type=jnp.float32)
    h = jnp.maximum(h + b1_ref[...], 0.0)                              # (B, 256)
    y = jnp.sum(h * w2_ref[...].astype(jnp.float32), axis=-1, keepdims=True)
    o_ref[...] = jax.nn.sigmoid(y + b2_ref[idx_ref[0]])                # (B, 1)


# ------------------------------ wrappers --------------------------------------
def _default_binary_groups():
    # v7x has two TensorCores/chip: a 2-way "parallel" grid lets each TC stream
    # half of w1cat.  v5e/v6e: one step, single-buffered weights.
    try:
        kind = jax.devices()[0].device_kind.lower()
    except Exception:
        return 1
    return 2 if "7" in kind else 1


def multiclass_forward(feats, p):
    w1, b1, w2, b2, w3p, b3p = p
    bsz = feats.shape[0]
    cost = pl.CostEstimate(
        flops=2 * bsz * (IN_FEATURES * HID1 + HID1 * HID2 + HID2 * OUT_PAD),
        transcendentals=0,
        bytes_accessed=2 * (IN_FEATURES * HID1 + HID1 * HID2 + HID2 * OUT_PAD)
        + 4 * (HID1 + HID2 + OUT_PAD) + 2 * bsz * IN_FEATURES
        + 4 * bsz * OUT_PAD)
    out = pl.pallas_call(
        multiclass_kernel,
        out_shape=jax.ShapeDtypeStruct((bsz, OUT_PAD), jnp.float32),
        in_specs=[_VMEM] * 7,
        out_specs=_VMEM,
        cost_estimate=cost,
    )(feats, w1, b1, w2, b2, w3p, b3p)
    return out[:, :NUM_CLASSES]


def binary_all_forward(feats, p, groups=None):
    if groups is None:
        groups = _default_binary_groups()
    assert NUM_CLASSES % groups == 0 and (BIN_TOTAL // groups) % 128 == 0
    bsz = feats.shape[0]
    hpg = NUM_CLASSES // groups
    gw = BIN_TOTAL // groups
    b2g = p["b2"].reshape(groups, 1, hpg)        # tiny weight reshape (metadata)
    cost = pl.CostEstimate(
        flops=2 * bsz * IN_FEATURES * BIN_TOTAL + 4 * bsz * BIN_TOTAL,
        transcendentals=bsz * NUM_CLASSES,
        bytes_accessed=2 * IN_FEATURES * BIN_TOTAL + 6 * BIN_TOTAL
        + 2 * bsz * IN_FEATURES + 4 * groups * bsz * OUT_PAD)
    out_shape = jax.ShapeDtypeStruct((groups, bsz, OUT_PAD), jnp.float32)

    if groups == 1:
        # single step, no grid: w1cat (5 MiB bf16) resident once in VMEM
        out = pl.pallas_call(
            binary_group_kernel,
            out_shape=out_shape,
            in_specs=[_VMEM] * 5,
            out_specs=_VMEM,
            cost_estimate=cost,
        )(feats, p["w1cat"], p["b1"], p["w2flat"], b2g)
        return out[0, :, :NUM_CLASSES]            # torch.cat order directly
    out = pl.pallas_call(
        binary_group_kernel,
        out_shape=out_shape,
        grid=(groups,),
        in_specs=[
            pl.BlockSpec((bsz, IN_FEATURES), lambda g: (0, 0)),
            pl.BlockSpec((IN_FEATURES, gw), lambda g: (0, g)),
            pl.BlockSpec((1, gw), lambda g: (0, g)),
            pl.BlockSpec((1, gw), lambda g: (0, g)),
            pl.BlockSpec((1, 1, hpg), lambda g: (g, 0, 0)),
        ],
        out_specs=pl.BlockSpec((1, bsz, OUT_PAD), lambda g: (g, 0, 0)),
        compiler_params=pltpu.CompilerParams(
            dimension_semantics=("parallel",)),
        cost_estimate=cost,
    )(feats, p["w1cat"], p["b1"], p["w2flat"], b2g)
    probs = out[:, :, :hpg]                                      # (G, B, hpg)
    return jnp.transpose(probs, (1, 0, 2)).reshape(bsz, NUM_CLASSES)


def binary_one_forward(feats, p, idx):
    bsz = feats.shape[0]
    idx_arr = jnp.asarray(idx, jnp.int32).reshape((1,))
    cost = pl.CostEstimate(
        flops=2 * bsz * IN_FEATURES * BIN_HID + 2 * bsz * BIN_HID,
        transcendentals=bsz,
        bytes_accessed=2 * IN_FEATURES * BIN_HID + 6 * BIN_HID
        + 2 * bsz * IN_FEATURES + 4 * bsz)
    grid_spec = pltpu.PrefetchScalarGridSpec(
        num_scalar_prefetch=1,
        grid=(1,),
        in_specs=[
            pl.BlockSpec((bsz, IN_FEATURES), lambda i, idx_ref: (0, 0)),
            pl.BlockSpec((IN_FEATURES, BIN_HID),
                         lambda i, idx_ref: (0, idx_ref[0])),
            pl.BlockSpec((1, BIN_HID), lambda i, idx_ref: (0, idx_ref[0])),
            pl.BlockSpec((1, BIN_HID), lambda i, idx_ref: (0, idx_ref[0])),
            _SMEM,                                # full (20,) f32 bias vector
        ],
        out_specs=pl.BlockSpec((bsz, 1), lambda i, idx_ref: (0, 0)),
    )
    return pl.pallas_call(
        binary_one_kernel,
        grid_spec=grid_spec,
        out_shape=jax.ShapeDtypeStruct((bsz, 1), jnp.float32),
        cost_estimate=cost,
    )(idx_arr, feats, p["w1cat"], p["b1"], p["w2flat"], p["b2"])


# ---------------------------- parameter init ----------------------------------
def _linear_init(key, fan_in, fan_out):
    # PyTorch nn.Linear default init: U(-1/sqrt(fan_in), 1/sqrt(fan_in)).
    # Weight stored as (in, out) so kernels do y = x @ W + b.
    kw, kb = jax.random.split(key)
    bound = 1.0 / np.sqrt(fan_in)
    w = jax.random.uniform(kw, (fan_in, fan_out), jnp.float32, -bound, bound)
    b = jax.random.uniform(kb, (fan_out,), jnp.float32, -bound, bound)
    return w, b


def init_params(key):
    k1, k2, k3, kbin = jax.random.split(key, 4)
    w1, b1 = _linear_init(k1, IN_FEATURES, HID1)
    w2, b2 = _linear_init(k2, HID1, HID2)
    w3, b3 = _linear_init(k3, HID2, NUM_CLASSES)
    # pad final layer to 128 output lanes for an unmasked lane-dense store
    w3p = jnp.zeros((HID2, OUT_PAD), jnp.float32).at[:, :NUM_CLASSES].set(w3)
    b3p = jnp.zeros((OUT_PAD,), jnp.float32).at[:NUM_CLASSES].set(b3)
    classifier = (w1.astype(jnp.bfloat16), b1.reshape(1, -1),
                  w2.astype(jnp.bfloat16), b2.reshape(1, -1),
                  w3p.astype(jnp.bfloat16), b3p.reshape(1, -1))

    hw1s, hb1s, hw2s, hb2s = [], [], [], []
    for hk in jax.random.split(kbin, NUM_CLASSES):
        ka, kb_ = jax.random.split(hk)
        hw1, hb1 = _linear_init(ka, IN_FEATURES, BIN_HID)
        hw2, hb2 = _linear_init(kb_, BIN_HID, 1)
        hw1s.append(hw1); hb1s.append(hb1)
        hw2s.append(hw2[:, 0]); hb2s.append(hb2)

    binary = {
        # head n occupies columns [n*256, (n+1)*256) in every (.., 5120) array
        "w1cat": jnp.concatenate(hw1s, axis=1).astype(jnp.bfloat16),   # (512,5120)
        "b1": jnp.concatenate(hb1s).reshape(1, -1),                    # (1,5120) f32
        "w2flat": jnp.stack(hw2s).reshape(1, -1).astype(jnp.bfloat16), # (1,5120)
        "b2": jnp.concatenate(hb2s).reshape(-1),                       # (20,)  f32
    }
    return {"classifier_20": classifier, "binary": binary}


# ------------------------------- forward --------------------------------------
def char_model_forward(x, params, head_type="multiclass", binary_index=None):
    # GAP in the wrapper: (B, C, H, W) -> (B, C), cast once to bf16.  Only the
    # 2 KiB pooled features stream into the head kernels (no NCHW transpose).
    feats = jnp.mean(x, axis=(2, 3)).astype(jnp.bfloat16)
    if head_type == "multiclass":
        return multiclass_forward(feats, params["classifier_20"])
    elif head_type == "binary":
        if binary_index is not None:
            return binary_one_forward(feats, params["binary"], binary_index)
        return binary_all_forward(feats, params["binary"])
    raise ValueError("Invalid head_type. Choose 'multiclass' or 'binary'.")


# ----------------------------- pure-JAX reference ------------------------------
def _mm(a, w_bf16):
    # mirrors the kernel math: bf16 operands, f32 accumulation
    return jnp.dot(a.astype(jnp.bfloat16), w_bf16,
                   preferred_element_type=jnp.float32)


def ref_forward(x, params, head_type="multiclass", binary_index=None):
    feats = x.mean(axis=(2, 3))
    if head_type == "multiclass":
        w1, b1, w2, b2, w3p, b3p = params["classifier_20"]
        h = jnp.maximum(_mm(feats, w1) + b1, 0.0)
        h = jnp.maximum(_mm(h, w2) + b2, 0.0)
        return (_mm(h, w3p) + b3p)[:, :NUM_CLASSES]
    bp = params["binary"]
    if binary_index is not None:
        lo = binary_index * BIN_HID
        h = jnp.maximum(_mm(feats, bp["w1cat"][:, lo:lo + BIN_HID])
                        + bp["b1"][:, lo:lo + BIN_HID], 0.0)
        y = jnp.sum(h * bp["w2flat"][:, lo:lo + BIN_HID].astype(jnp.float32),
                    axis=-1, keepdims=True) + bp["b2"][binary_index]
        return jax.nn.sigmoid(y)
    h = jnp.maximum(_mm(feats, bp["w1cat"]) + bp["b1"], 0.0)
    z = h * bp["w2flat"].astype(jnp.float32)
    y = z.reshape(feats.shape[0], NUM_CLASSES, BIN_HID).sum(axis=-1) \
        + bp["b2"][None, :]
    return jax.nn.sigmoid(y)


# --------------------------------- main ----------------------------------------
if __name__ == "__main__":
    key = jax.random.PRNGKey(0)
    kx, kp = jax.random.split(key)
    x = jax.random.normal(kx, (B, IN_FEATURES, H, W), jnp.float32)  # NCHW
    params = init_params(kp)

    logits = char_model_forward(x, params, head_type="multiclass")
    probs = char_model_forward(x, params, head_type="binary")
    prob3 = char_model_forward(x, params, head_type="binary", binary_index=3)
    jax.block_until_ready((logits, probs, prob3))

    assert logits.shape == (B, NUM_CLASSES)
    assert probs.shape == (B, NUM_CLASSES)
    assert prob3.shape == (B, 1)

    ref_logits = ref_forward(x, params, "multiclass")
    ref_probs = ref_forward(x, params, "binary")
    ref_prob3 = ref_forward(x, params, "binary", binary_index=3)

    np.testing.assert_allclose(np.asarray(logits), np.asarray(ref_logits),
                               rtol=2e-3, atol=2e-3)
    np.testing.assert_allclose(np.asarray(probs), np.asarray(ref_probs),
                               rtol=2e-3, atol=2e-3)
    np.testing.assert_allclose(np.asarray(prob3), np.asarray(ref_prob3),
                               rtol=2e-3, atol=2e-3)

    # exercise both binary-all variants (1-step v5e/v6e form, 2-way v7x form)
    # regardless of which chip we happen to be running on
    feats = jnp.mean(x, axis=(2, 3)).astype(jnp.bfloat16)
    for g in (1, 2):
        pg = jax.block_until_ready(
            binary_all_forward(feats, params["binary"], groups=g))
        np.testing.assert_allclose(np.asarray(pg), np.asarray(ref_probs),
                                   rtol=2e-3, atol=2e-3)

    print("KERNEL_OK")
</pallas_src>

<mosaic_0001>
module attributes {stable_mosaic.version = 11 : i64} {
  func.func @multiclass_kernel(%arg0: memref<2x512xbf16, #tpu.memory_space<vmem>>, %arg1: memref<512x512xbf16, #tpu.memory_space<vmem>>, %arg2: memref<1x512xf32, #tpu.memory_space<vmem>>, %arg3: memref<512x256xbf16, #tpu.memory_space<vmem>>, %arg4: memref<1x256xf32, #tpu.memory_space<vmem>>, %arg5: memref<256x128xbf16, #tpu.memory_space<vmem>>, %arg6: memref<1x128xf32, #tpu.memory_space<vmem>>, %arg7: memref<2x128xf32, #tpu.memory_space<vmem>>) attributes {dimension_semantics = [], scalar_prefetch = 0 : i64, scratch_operands = 0 : i64, tpu.core_type = #tpu.core_type<tc>} {
    %c0 = arith.constant 0 : index
    %c0_0 = arith.constant 0 : index
    %0 = vector.load %arg0[%c0, %c0_0] : memref<2x512xbf16, #tpu.memory_space<vmem>>, vector<2x512xbf16>
    %c0_1 = arith.constant 0 : index
    %c0_2 = arith.constant 0 : index
    %1 = vector.load %arg1[%c0_1, %c0_2] : memref<512x512xbf16, #tpu.memory_space<vmem>>, vector<512x512xbf16>
    %cst = arith.constant dense<0.000000e+00> : vector<2x512xf32>
    %2 = tpu.matmul %0, %1, %cst {dimension_numbers = #tpu.dot_dimension_numbers<[1], [0], [0], [1], [0, 0, 1, 1], [], []>} : vector<2x512xbf16>, vector<512x512xbf16>, vector<2x512xf32> -> vector<2x512xf32>
    %c0_3 = arith.constant 0 : index
    %c0_4 = arith.constant 0 : index
    %3 = vector.load %arg2[%c0_3, %c0_4] : memref<1x512xf32, #tpu.memory_space<vmem>>, vector<1x512xf32>
    %4 = vector.broadcast %3 : vector<1x512xf32> to vector<2x512xf32>
    %5 = arith.addf %2, %4 : vector<2x512xf32>
    %cst_5 = arith.constant 0.000000e+00 : f32
    %6 = vector.broadcast %cst_5 : f32 to vector<2x512xf32>
    %7 = arith.maximumf %5, %6 : vector<2x512xf32>
    %8 = arith.truncf %7 : vector<2x512xf32> to vector<2x512xbf16>
    %c0_6 = arith.constant 0 : index
    %c0_7 = arith.constant 0 : index
    %9 = vector.load %arg3[%c0_6, %c0_7] : memref<512x256xbf16, #tpu.memory_space<vmem>>, vector<512x256xbf16>
    %cst_8 = arith.constant dense<0.000000e+00> : vector<2x256xf32>
    %10 = tpu.matmul %8, %9, %cst_8 {dimension_numbers = #tpu.dot_dimension_numbers<[1], [0], [0], [1], [0, 0, 1, 1], [], []>} : vector<2x512xbf16>, vector<512x256xbf16>, vector<2x256xf32> -> vector<2x256xf32>
    %c0_9 = arith.constant 0 : index
    %c0_10 = arith.constant 0 : index
    %11 = vector.load %arg4[%c0_9, %c0_10] : memref<1x256xf32, #tpu.memory_space<vmem>>, vector<1x256xf32>
    %12 = vector.broadcast %11 : vector<1x256xf32> to vector<2x256xf32>
    %13 = arith.addf %10, %12 : vector<2x256xf32>
    %cst_11 = arith.constant 0.000000e+00 : f32
    %14 = vector.broadcast %cst_11 : f32 to vector<2x256xf32>
    %15 = arith.maximumf %13, %14 : vector<2x256xf32>
    %16 = arith.truncf %15 : vector<2x256xf32> to vector<2x256xbf16>
    %c0_12 = arith.constant 0 : index
    %c0_13 = arith.constant 0 : index
    %17 = vector.load %arg5[%c0_12, %c0_13] : memref<256x128xbf16, #tpu.memory_space<vmem>>, vector<256x128xbf16>
    %cst_14 = arith.constant dense<0.000000e+00> : vector<2x128xf32>
    %18 = tpu.matmul %16, %17, %cst_14 {dimension_numbers = #tpu.dot_dimension_numbers<[1], [0], [0], [1], [0, 0, 1, 1], [], []>} : vector<2x256xbf16>, vector<256x128xbf16>, vector<2x128xf32> -> vector<2x128xf32>
    %c0_15 = arith.constant 0 : index
    %c0_16 = arith.constant 0 : index
    %19 = vector.load %arg6[%c0_15, %c0_16] : memref<1x128xf32, #tpu.memory_space<vmem>>, vector<1x128xf32>
    %20 = vector.broadcast %19 : vector<1x128xf32> to vector<2x128xf32>
    %21 = arith.addf %18, %20 : vector<2x128xf32>
    %c0_17 = arith.constant 0 : index
    %c0_18 = arith.constant 0 : index
    %22 = vector.load %arg7[%c0_17, %c0_18] : memref<2x128xf32, #tpu.memory_space<vmem>>, vector<2x128xf32>
    tpu.vector_store %arg7[%c0_17, %c0_18], %21 {strides = array<i32>} : memref<2x128xf32, #tpu.memory_space<vmem>>, vector<2x128xf32>,
    return
  }
}

</mosaic_0001>

<bundles_post_ra>
// kernel: tpu_custom_call.1
= control target key start
LH: loop header
LB: loop body
LE: loop exit
PB: predicated region body
PF: predicated region fallthrough
CT: control target
= control target key end

     0   :  { %12 = vsyncpa [#allocation3], 0  ;;  %s2586_s0 = inlined_call_operand.hbm [shape: bf16[2,512], index: 0, kind: input, shape index: {}]   ;;  %s2587_s1 = inlined_call_operand.hbm [shape: bf16[512,512], index: 1, kind: input, shape index: {}]   ;;  %s2588_s2 = inlined_call_operand.vmem [shape: f32[1,512], index: 2, kind: input, shape index: {}]   ;;  %s2589_s3 = inlined_call_operand.hbm [shape: bf16[512,256], index: 3, kind: input, shape index: {}]   ;;  %s2590_s4 = inlined_call_operand.vmem [shape: f32[1,256], index: 4, kind: input, shape index: {}]   ;;  %s2591_s5 = inlined_call_operand.hbm [shape: bf16[256,128], index: 5, kind: input, shape index: {}]   ;;  %s2592_s6 = inlined_call_operand.vmem [shape: f32[1,128], index: 6, kind: input, shape index: {}]   ;;  %s2593_s7 = inlined_call_operand.hbm [shape: f32[2,128], index: 7, kind: output, shape index: {}]  }
   0x1   :  { %13 = vsyncpa [#allocation6], 0 }
   0x2   :  { %14 = vsyncpa [#allocation9], 0 }
   0x3   :  { %15 = vsyncpa [#allocation4], 0  ;;  %s2430_s24 = smov [#allocation5]   ;;  %s2312_s28 = scalar_lea.hbm %s2587_s1, 16384 }
   0x4   :  { %s31_s25 = sshll.u32 %s2430_s24, 4  ;;  %p2313_p0 = scmp.ne.s32.totalorder %s2587_s1, %s2312_s28  ;;  %s32_s25 = int_to_ptr.vmem [resolvable:$true] %s31_s25 }
   0x5   :  { %p2316_p1 = scmp.lt.u32.totalorder %s2312_s28, %s2587_s1 }
   0x7   :  { %p2318_p2 = pnand %p2316_p1, %p2313_p0 }
   0x9   :  { %2321 = shalt.err (!%p2318_p2)
}
   0xa   :  { %s2322_s10 = scalar_lea.vmem %s32_s25, 16384  ;;  %p2327_p4 = scmp.lt.s32.totalorder %s32_s25, %s32_s25 }
   0xb   :  { %p2323_p3 = scmp.ne.s32.totalorder %s32_s25, %s2322_s10  ;;  %p2328_p5 = scmp.lt.s32.totalorder %s2322_s10, %s2322_s10 }
   0xd   :  { %p2329_p6 = por %p2328_p5, %p2327_p4 }
   0xf   :  { %p2330_p7 = pnand %p2329_p6, %p2323_p3 }
  0x11   :  { %2333 = shalt.err (!%p2330_p7)
}
  0x12   :  { %s2431_s11 = smov 256   ;;  %s2432_s12 = smov 16  }
  0x13   :  { %37 = dma.hbm_to_vmem [thread:$0]  %s2587_s1, 16384, %s32_s25, [#allocation6], %s2431_s11, %s2431_s11, %s2432_s12  }
  0x14   :  { %s2433_s15 = smov [#allocation2]   ;;  %s2434_s17 = smov [#allocation7]  }
  0x15   :  { %s22_s16 = sshll.u32 %s2433_s15, 4  ;;  %s45_s18 = sshll.u32 %s2434_s17, 4  ;;  %s23_s16 = int_to_ptr.vmem [resolvable:$true] %s22_s16  ;;  %s46_s18 = int_to_ptr.vmem [resolvable:$true] %s45_s18 }
  0x16   :  { %s2334_s21 = scalar_lea.hbm %s2586_s0, 64 }
  0x17   :  { %p2335_p8 = scmp.ne.s32.totalorder %s2586_s0, %s2334_s21  ;;  %p2338_p9 = scmp.lt.u32.totalorder %s2334_s21, %s2586_s0 }
  0x19   :  { %p2340_p10 = pnand %p2338_p9, %p2335_p8 }
  0x1b   :  { %2343 = shalt.err (!%p2340_p10)
}
  0x1c   :  { %s2344_s1 = scalar_lea.vmem %s23_s16, 64  ;;  %p2349_p12 = scmp.lt.s32.totalorder %s23_s16, %s23_s16 }
  0x1d   :  { %p2345_p11 = scmp.ne.s32.totalorder %s23_s16, %s2344_s1  ;;  %p2350_p13 = scmp.lt.s32.totalorder %s2344_s1, %s2344_s1 }
  0x1f   :  { %p2351_p0 = por %p2350_p13, %p2349_p12 }
  0x21   :  { %p2352_p1 = pnand %p2351_p0, %p2345_p11 }
  0x23   :  { %2355 = shalt.err (!%p2352_p1)
}
  0x24   :  { %25 = dma.hbm_to_vmem [thread:$0]  %s2586_s0, 64, %s23_s16, [#allocation3]  }
  0x25   :  { %s2356_s30 = scalar_lea.hbm %s2589_s3, 8192 }
  0x26   :  { %p2357_p2 = scmp.ne.s32.totalorder %s2589_s3, %s2356_s30  ;;  %p2360_p3 = scmp.lt.u32.totalorder %s2356_s30, %s2589_s3 }
  0x28   :  { %p2362_p4 = pnand %p2360_p3, %p2357_p2 }
  0x2a   :  { %2365 = shalt.err (!%p2362_p4)
}
  0x2b   :  { %s2366_s12 = scalar_lea.vmem %s46_s18, 8192  ;;  %p2371_p6 = scmp.lt.s32.totalorder %s46_s18, %s46_s18 }
  0x2c   :  { %p2367_p5 = scmp.ne.s32.totalorder %s46_s18, %s2366_s12  ;;  %p2372_p7 = scmp.lt.s32.totalorder %s2366_s12, %s2366_s12 }
  0x2e   :  { %p2373_p8 = por %p2372_p7, %p2371_p6 }
  0x30   :  { %p2374_p9 = pnand %p2373_p8, %p2367_p5 }
  0x32   :  { %2377 = shalt.err (!%p2374_p9)
}
  0x33   :  { %s2435_s0 = smov 128   ;;  %s2436_s13 = smov 8  }
  0x34   :  { %51 = dma.hbm_to_vmem [thread:$0]  %s2589_s3, 8192, %s46_s18, [#allocation6], %s2435_s0, %s2435_s0, %s2436_s13  }
  0x35   :  { %s2437_s16 = smov [#allocation8]   ;;  %s2378_s21 = scalar_lea.hbm %s2591_s5, 2048 }
  0x36   :  { %s59_s17 = sshll.u32 %s2437_s16, 4  ;;  %p2379_p10 = scmp.ne.s32.totalorder %s2591_s5, %s2378_s21  ;;  %s60_s17 = int_to_ptr.vmem [resolvable:$true] %s59_s17 }
  0x37   :  { %p2382_p11 = scmp.lt.u32.totalorder %s2378_s21, %s2591_s5 }
  0x39   :  { %p2384_p12 = pnand %p2382_p11, %p2379_p10 }
  0x3b   :  { %2387 = shalt.err (!%p2384_p12)
}
  0x3c   :  { %s2388_s1 = scalar_lea.vmem %s60_s17, 2048  ;;  %p2393_p0 = scmp.lt.s32.totalorder %s60_s17, %s60_s17 }
  0x3d   :  { %p2389_p13 = scmp.ne.s32.totalorder %s60_s17, %s2388_s1  ;;  %p2394_p1 = scmp.lt.s32.totalorder %s2388_s1, %s2388_s1 }
  0x3f   :  { %p2395_p2 = por %p2394_p1, %p2393_p0 }
  0x41   :  { %p2396_p3 = pnand %p2395_p2, %p2389_p13 }
  0x43   :  { %2399 = shalt.err (!%p2396_p3)
}
  0x44   :  { %s2438_s3 = smov 64   ;;  %s2439_s18 = smov 4  }
  0x45   :  { %65 = dma.hbm_to_vmem [thread:$0]  %s2591_s5, 2048, %s60_s17, [#allocation9], %s2438_s3, %s2438_s3, %s2439_s18  }
  0x46   :  { %2422 = dma.done.wait [#allocation3], 64  }
  0x47   :  { %2423 = vsyncadd [#allocation3], 4294967232 }
  0x48   :  { %2424 = dma.done.wait [#allocation6], 24576  }
  0x49   :  { %2425 = vsyncadd [#allocation6], 4294942720 }
  0x4a   :  { %2426 = dma.done.wait [#allocation9], 2048  }
  0x4b   :  { %2427 = vsyncadd [#allocation9], 4294965248  ;;  %v2008_v0 = vld [vmem:[#allocation5 + $0x4] ss:$16 sps:$4 sm:$0xff]   ;;  %v2010_v1 = vld [vmem:[#allocation5] ss:$16 sps:$4 sm:$0xff]   ;;  %v212_v37 = vlaneseq }
  0x4c   :  { %901 = vmatprep.subr.bf16.mxu1 %v2008_v0  ;;  %v2011_v2 = vld [vmem:[#allocation5 + $0x204] ss:$16 sps:$4 sm:$0xff]   ;;  %v2013_v3 = vld [vmem:[#allocation5 + $0x200] ss:$16 sps:$4 sm:$0xff]   ;;  %v2440_v38 = vmov 1966171168  }
  0x4d   :  { %902 = vmatpush1.bf16.msra.mxu1 %v2010_v1  ;;  %v2014_v4 = vld [vmem:[#allocation5 + $0x24] ss:$16 sps:$4 sm:$0xff]   ;;  %v2016_v5 = vld [vmem:[#allocation5 + $0x20] ss:$16 sps:$4 sm:$0xff]   ;;  %942 = vmatprep.subr.bf16.mxu0 %v2011_v2  ;;  %v242_v39 = vunpack.c.l.s4 %v2440_v38  ;;  %v2530_v44 = vshrl.u32 %v212_v37, 7  ;;  %s2441_s8 = smov [#allocation10]  }
  0x4e   :  { %v2017_v6 = vld [vmem:[#allocation5 + $0x224] ss:$16 sps:$4 sm:$0xff]   ;;  %943 = vmatpush1.bf16.msra.mxu0 %v2013_v3  ;;  %903 = vmatprep.subr.bf16.mxu1 %v2014_v4  ;;  %v2019_v7 = vld [vmem:[#allocation5 + $0x220] ss:$16 sps:$4 sm:$0xff]   ;;  %v2133_v37 = vld [vmem:[#allocation5 + $0x12c] ss:$16 sps:$4 sm:$0xff]  }
  0x4f   :  { %944 = vmatprep.subr.bf16.mxu0 %v2017_v6  ;;  %v2020_v8 = vld [vmem:[#allocation5 + $0x44] ss:$16 sps:$4 sm:$0xff]   ;;  %v2022_v9 = vld [vmem:[#allocation5 + $0x40] ss:$16 sps:$4 sm:$0xff]   ;;  %v243_v45 = vunpack.c.0.s8 %v242_v39  ;;  %v2131_v38 = vld [vmem:[#allocation5 + $0x128] ss:$16 sps:$4 sm:$0xff]  }
  0x50   :  { %v2023_v10 = vld [vmem:[#allocation5 + $0x244] ss:$16 sps:$4 sm:$0xff]   ;;  %v2025_v12 = vld [vmem:[#allocation5 + $0x240] ss:$16 sps:$4 sm:$0xff]   ;;  %s1737_s9 = sshll.u32 %s2441_s8, 4  ;;  %s1738_s9 = int_to_ptr.vmem [resolvable:$true] %s1737_s9 }
  0x51   :  { %904 = vmatpush1.bf16.msra.mxu1 %v2016_v5  ;;  %v2026_v11 = vld [vmem:[#allocation5 + $0x64] ss:$16 sps:$4 sm:$0xff]   ;;  %v2028_v14 = vld [vmem:[#allocation5 + $0x60] ss:$16 sps:$4 sm:$0xff]   ;;  %v246_v50 = vsub.s32 %v243_v45, %v2530_v44  ;;  %s2400_s10 = scalar_lea.vmem %s1738_s9, 32  ;;  %p2405_p5 = scmp.lt.s32.totalorder %s1738_s9, %s1738_s9 }
  0x52   :  { %905 = vmatprep.subr.bf16.mxu1 %v2020_v8  ;;  %945 = vmatpush1.bf16.msra.mxu0 %v2019_v7  ;;  %v2029_v13 = vld [vmem:[#allocation5 + $0x264] ss:$16 sps:$4 sm:$0xff]   ;;  %v2031_v16 = vld [vmem:[#allocation5 + $0x260] ss:$16 sps:$4 sm:$0xff]   ;;  %p2401_p4 = scmp.ne.s32.totalorder %s1738_s9, %s2400_s10  ;;  %p2406_p6 = scmp.lt.s32.totalorder %s2400_s10, %s2400_s10 }
  0x53   :  { %946 = vmatprep.subr.bf16.mxu0 %v2023_v10  ;;  %v2032_v15 = vld [vmem:[#allocation5 + $0x84] ss:$16 sps:$4 sm:$0xff]   ;;  %v2034_v18 = vld [vmem:[#allocation5 + $0x80] ss:$16 sps:$4 sm:$0xff]   ;;  %v2106_v10 = vld [vmem:[#allocation5 + $0xc] ss:$16 sps:$4 sm:$0xff]  }
  0x54   :  { %v2035_v17 = vld [vmem:[#allocation5 + $0x284] ss:$16 sps:$4 sm:$0xff]   ;;  %v2037_v20 = vld [vmem:[#allocation5 + $0x280] ss:$16 sps:$4 sm:$0xff]   ;;  %p2407_p7 = por %p2406_p6, %p2405_p5 }
  0x55   :  { %906 = vmatpush1.bf16.msra.mxu1 %v2022_v9  ;;  %v2038_v19 = vld [vmem:[#allocation5 + $0xa4] ss:$16 sps:$4 sm:$0xff]   ;;  %v2040_v22 = vld [vmem:[#allocation5 + $0xa0] ss:$16 sps:$4 sm:$0xff]  }
  0x56   :  { %907 = vmatprep.subr.bf16.mxu1 %v2026_v11  ;;  %947 = vmatpush1.bf16.msra.mxu0 %v2025_v12  ;;  %v2041_v21 = vld [vmem:[#allocation5 + $0x2a4] ss:$16 sps:$4 sm:$0xff]   ;;  %v2043_v24 = vld [vmem:[#allocation5 + $0x2a0] ss:$16 sps:$4 sm:$0xff]   ;;  %v2104_v12 = vld [vmem:[#allocation5 + $0x8] ss:$16 sps:$4 sm:$0xff]   ;;  %p2408_p8 = pnand %p2407_p7, %p2401_p4 }
  0x57   :  { %948 = vmatprep.subr.bf16.mxu0 %v2029_v13  ;;  %v2044_v23 = vld [vmem:[#allocation5 + $0xc4] ss:$16 sps:$4 sm:$0xff]   ;;  %v2046_v26 = vld [vmem:[#allocation5 + $0xc0] ss:$16 sps:$4 sm:$0xff]  }
  0x58   :  { %v2047_v25 = vld [vmem:[#allocation5 + $0x2c4] ss:$16 sps:$4 sm:$0xff]   ;;  %v2049_v28 = vld [vmem:[#allocation5 + $0x2c0] ss:$16 sps:$4 sm:$0xff]  }
  0x59   :  { %908 = vmatpush1.bf16.msra.mxu1 %v2028_v14  ;;  %v2050_v27 = vld [vmem:[#allocation5 + $0xe4] ss:$16 sps:$4 sm:$0xff]   ;;  %v2052_v30 = vld [vmem:[#allocation5 + $0xe0] ss:$16 sps:$4 sm:$0xff]   ;;  %v2109_v14 = vld [vmem:[#allocation5 + $0x2c] ss:$16 sps:$4 sm:$0xff]  }
  0x5a   :  { %909 = vmatprep.subr.bf16.mxu1 %v2032_v15  ;;  %949 = vmatpush1.bf16.msra.mxu0 %v2031_v16  ;;  %v2053_v29 = vld [vmem:[#allocation5 + $0x2e4] ss:$16 sps:$4 sm:$0xff]   ;;  %v2055_v32 = vld [vmem:[#allocation5 + $0x2e0] ss:$16 sps:$4 sm:$0xff]   ;;  %v2107_v15 = vld [vmem:[#allocation5 + $0x28] ss:$16 sps:$4 sm:$0xff]  }
  0x5b   :  { %950 = vmatprep.subr.bf16.mxu0 %v2035_v17  ;;  %v2056_v31 = vld [vmem:[#allocation5 + $0x104] ss:$16 sps:$4 sm:$0xff]   ;;  %v2058_v34 = vld [vmem:[#allocation5 + $0x100] ss:$16 sps:$4 sm:$0xff]   ;;  %v2112_v16 = vld [vmem:[#allocation5 + $0x4c] ss:$16 sps:$4 sm:$0xff]  }
  0x5c   :  { %v2059_v33 = vld [vmem:[#allocation5 + $0x304] ss:$16 sps:$4 sm:$0xff]   ;;  %v2061_v36 = vld [vmem:[#allocation5 + $0x300] ss:$16 sps:$4 sm:$0xff]   ;;  %v2110_v17 = vld [vmem:[#allocation5 + $0x48] ss:$16 sps:$4 sm:$0xff]  }
  0x5d   :  { %910 = vmatpush1.bf16.msra.mxu1 %v2034_v18  ;;  %v2062_v35 = vld [vmem:[#allocation5 + $0x124] ss:$16 sps:$4 sm:$0xff]   ;;  %v2064_v41 = vld [vmem:[#allocation5 + $0x120] ss:$16 sps:$4 sm:$0xff]   ;;  %v2115_v18 = vld [vmem:[#allocation5 + $0x6c] ss:$16 sps:$4 sm:$0xff]  }
  0x5e   :  { %911 = vmatprep.subr.bf16.mxu1 %v2038_v19  ;;  %951 = vmatpush1.bf16.msra.mxu0 %v2037_v20  ;;  %v2065_v40 = vld [vmem:[#allocation5 + $0x324] ss:$16 sps:$4 sm:$0xff]   ;;  %v2067_v43 = vld [vmem:[#allocation5 + $0x320] ss:$16 sps:$4 sm:$0xff]   ;;  %v2113_v19 = vld [vmem:[#allocation5 + $0x68] ss:$16 sps:$4 sm:$0xff]  }
  0x5f   :  { %952 = vmatprep.subr.bf16.mxu0 %v2041_v21  ;;  %v2068_v42 = vld [vmem:[#allocation5 + $0x144] ss:$16 sps:$4 sm:$0xff]   ;;  %v2070_v47 = vld [vmem:[#allocation5 + $0x140] ss:$16 sps:$4 sm:$0xff]   ;;  %v2118_v20 = vld [vmem:[#allocation5 + $0x8c] ss:$16 sps:$4 sm:$0xff]  }
  0x60   :  { %v2071_v46 = vld [vmem:[#allocation5 + $0x344] ss:$16 sps:$4 sm:$0xff]   ;;  %v2073_v49 = vld [vmem:[#allocation5 + $0x340] ss:$16 sps:$4 sm:$0xff]   ;;  %v2116_v21 = vld [vmem:[#allocation5 + $0x88] ss:$16 sps:$4 sm:$0xff]  }
  0x61   :  { %912 = vmatpush1.bf16.msra.mxu1 %v2040_v22  ;;  %v2074_v48 = vld [vmem:[#allocation5 + $0x164] ss:$16 sps:$4 sm:$0xff]   ;;  %v1748_v52 = vld.sshfl [vmem:[#allocation2] sm:$0x33 pattern:$0x75316420] }
  0x62   :  { %913 = vmatprep.subr.bf16.mxu1 %v2044_v23  ;;  %953 = vmatpush1.bf16.msra.mxu0 %v2043_v24  ;;  %v2077_v51 = vld [vmem:[#allocation5 + $0x364] ss:$16 sps:$4 sm:$0xff]   ;;  %v2076_v53 = vld [vmem:[#allocation5 + $0x160] ss:$16 sps:$4 sm:$0xff]   ;;  %v240_v54 = vcombine.high %v1748_v52, %v1748_v52  ;;  %v2536_v9 = vrot.slane %v1748_v52, %v246_v50  ;;  %v2121_v22 = vld [vmem:[#allocation5 + $0xac] ss:$16 sps:$4 sm:$0xff]  }
  0x63   :  { %954 = vmatprep.subr.bf16.mxu0 %v2047_v25  ;;  %v2080_v55 = vld [vmem:[#allocation5 + $0x184] ss:$16 sps:$4 sm:$0xff]   ;;  %v2079_v56 = vld [vmem:[#allocation5 + $0x360] ss:$16 sps:$4 sm:$0xff]   ;;  %v2119_v23 = vld [vmem:[#allocation5 + $0xa8] ss:$16 sps:$4 sm:$0xff]  }
  0x64   :  { %v254_v57 = vrot.slane %v240_v54, %v246_v50  ;;  %v2083_v58 = vld [vmem:[#allocation5 + $0x384] ss:$16 sps:$4 sm:$0xff]   ;;  %v2082_v59 = vld [vmem:[#allocation5 + $0x180] ss:$16 sps:$4 sm:$0xff]   ;;  %v2540_v13 = vcombine.high %v2536_v9, %v2536_v9  ;;  %v2124_v24 = vld [vmem:[#allocation5 + $0xcc] ss:$16 sps:$4 sm:$0xff]  }
  0x65   :  { %914 = vmatpush1.bf16.msra.mxu1 %v2046_v26  ;;  %v2086_v61 = vld [vmem:[#allocation5 + $0x1a4] ss:$16 sps:$4 sm:$0xff]   ;;  %v2085_v62 = vld [vmem:[#allocation5 + $0x380] ss:$16 sps:$4 sm:$0xff]   ;;  %v2122_v25 = vld [vmem:[#allocation5 + $0xc8] ss:$16 sps:$4 sm:$0xff]  }
  0x66   :  { %915 = vmatprep.subr.bf16.mxu1 %v2050_v27  ;;  %955 = vmatpush1.bf16.msra.mxu0 %v2049_v28  ;;  %v2533_v60 = vcombine.high %v254_v57, %v254_v57  ;;  %v2089_v63 = vld [vmem:[#allocation5 + $0x3a4] ss:$16 sps:$4 sm:$0xff]   ;;  %v2088_v0 = vld [vmem:[#allocation5 + $0x1a0] ss:$16 sps:$4 sm:$0xff]   ;;  %v2127_v28 = vld [vmem:[#allocation5 + $0xec] ss:$16 sps:$4 sm:$0xff]  }
  0x67   :  { %956 = vmatprep.subr.bf16.mxu0 %v2053_v29  ;;  %933 = vmatprep.mubr.bf16.mxu1 %v254_v57  ;;  %v2092_v1 = vld [vmem:[#allocation5 + $0x1c4] ss:$16 sps:$4 sm:$0xff]   ;;  %v2091_v2 = vld [vmem:[#allocation5 + $0x3a0] ss:$16 sps:$4 sm:$0xff]   ;;  %v2142_v50 = vld [vmem:[#allocation5 + $0x18c] ss:$16 sps:$4 sm:$0xff]  }
  0x68   :  { %974 = vmatprep.mubr.bf16.mxu0 %v2533_v60  ;;  %v2095_v3 = vld [vmem:[#allocation5 + $0x3c4] ss:$16 sps:$4 sm:$0xff]   ;;  %v2094_v4 = vld [vmem:[#allocation5 + $0x1c0] ss:$16 sps:$4 sm:$0xff]   ;;  %v2140_v52 = vld [vmem:[#allocation5 + $0x188] ss:$16 sps:$4 sm:$0xff]  }
  0x69   :  { %916 = vmatpush1.bf16.msra.mxu1 %v2052_v30  ;;  %v2098_v5 = vld [vmem:[#allocation5 + $0x1e4] ss:$16 sps:$4 sm:$0xff]   ;;  %v2097_v6 = vld [vmem:[#allocation5 + $0x3c0] ss:$16 sps:$4 sm:$0xff]   ;;  %v2125_v30 = vld [vmem:[#allocation5 + $0xe8] ss:$16 sps:$4 sm:$0xff]  }
  0x6a   :  { %917 = vmatprep.subr.bf16.mxu1 %v2056_v31  ;;  %957 = vmatpush1.bf16.msra.mxu0 %v2055_v32  ;;  %v2101_v7 = vld [vmem:[#allocation5 + $0x3e4] ss:$16 sps:$4 sm:$0xff]   ;;  %v2100_v8 = vld [vmem:[#allocation5 + $0x1e0] ss:$16 sps:$4 sm:$0xff]   ;;  %v2145_v54 = vld [vmem:[#allocation5 + $0x1ac] ss:$16 sps:$4 sm:$0xff]  }
  0x6b   :  { %958 = vmatprep.subr.bf16.mxu0 %v2059_v33  ;;  %v2103_v11 = vld [vmem:[#allocation5 + $0x3e0] ss:$16 sps:$4 sm:$0xff]   ;;  %v2202_v27 = vld [vmem:[#allocation7 + $0x4] ss:$8 sps:$4 sm:$0xff]   ;;  %v2205_v29 = vld [vmem:[#allocation7 + $0x14] ss:$8 sps:$4 sm:$0xff]  }
  0x6c   :  { %v2200_v26 = vld [vmem:[#allocation7] ss:$8 sps:$4 sm:$0xff]   ;;  %v2203_v31 = vld [vmem:[#allocation7 + $0x10] ss:$8 sps:$4 sm:$0xff]   ;;  %v2208_v32 = vld [vmem:[#allocation7 + $0x24] ss:$8 sps:$4 sm:$0xff]  }
  0x6d   :  { %918 = vmatpush1.bf16.msra.mxu1 %v2058_v34  ;;  %v2130_v33 = vld [vmem:[#allocation5 + $0x10c] ss:$16 sps:$4 sm:$0xff]   ;;  %v2128_v34 = vld [vmem:[#allocation5 + $0x108] ss:$16 sps:$4 sm:$0xff]  }
  0x6e   :  { %919 = vmatprep.subr.bf16.mxu1 %v2062_v35  ;;  %959 = vmatpush1.bf16.msra.mxu0 %v2061_v36  ;;  %v2206_v35 = vld [vmem:[#allocation7 + $0x20] ss:$8 sps:$4 sm:$0xff]   ;;  %v2211_v36 = vld [vmem:[#allocation7 + $0x34] ss:$8 sps:$4 sm:$0xff]   ;;  %v2209_v39 = vld [vmem:[#allocation7 + $0x30] ss:$8 sps:$4 sm:$0xff]  }
  0x6f   :  { %960 = vmatprep.subr.bf16.mxu0 %v2065_v40  ;;  %v2214_v40 = vld [vmem:[#allocation7 + $0x44] ss:$8 sps:$4 sm:$0xff]   ;;  %v2217_v45 = vld [vmem:[#allocation7 + $0x54] ss:$8 sps:$4 sm:$0xff]  }
  0x71   :  { %920 = vmatpush1.bf16.msra.mxu1 %v2064_v41  ;;  %v2136_v41 = vld [vmem:[#allocation5 + $0x14c] ss:$16 sps:$4 sm:$0xff]  }
  0x72   :  { %921 = vmatprep.subr.bf16.mxu1 %v2068_v42  ;;  %961 = vmatpush1.bf16.msra.mxu0 %v2067_v43  ;;  %v2134_v42 = vld [vmem:[#allocation5 + $0x148] ss:$16 sps:$4 sm:$0xff]  }
  0x73   :  { %962 = vmatprep.subr.bf16.mxu0 %v2071_v46  ;;  %v2212_v43 = vld [vmem:[#allocation7 + $0x40] ss:$8 sps:$4 sm:$0xff]   ;;  %v2139_v46 = vld [vmem:[#allocation5 + $0x16c] ss:$16 sps:$4 sm:$0xff]  }
  0x75   :  { %922 = vmatpush1.bf16.msra.mxu1 %v2070_v47  ;;  %v2215_v47 = vld [vmem:[#allocation7 + $0x50] ss:$8 sps:$4 sm:$0xff]  }
  0x76   :  { %923 = vmatprep.subr.bf16.mxu1 %v2074_v48  ;;  %963 = vmatpush1.bf16.msra.mxu0 %v2073_v49  ;;  %v2137_v48 = vld [vmem:[#allocation5 + $0x168] ss:$16 sps:$4 sm:$0xff]   ;;  %v2220_v49 = vld [vmem:[#allocation7 + $0x64] ss:$8 sps:$4 sm:$0xff]  }
  0x77   :  { %964 = vmatprep.subr.bf16.mxu0 %v2077_v51  ;;  %v2218_v51 = vld [vmem:[#allocation7 + $0x60] ss:$8 sps:$4 sm:$0xff]  }
  0x79   :  { %924 = vmatpush1.bf16.msra.mxu1 %v2076_v53  ;;  %v2223_v53 = vld [vmem:[#allocation7 + $0x74] ss:$8 sps:$4 sm:$0xff]  }
  0x7a   :  { %925 = vmatprep.subr.bf16.mxu1 %v2080_v55  ;;  %965 = vmatpush1.bf16.msra.mxu0 %v2079_v56  ;;  %v2221_v55 = vld [vmem:[#allocation7 + $0x70] ss:$8 sps:$4 sm:$0xff]  }
  0x7b   :  { %966 = vmatprep.subr.bf16.mxu0 %v2083_v58  ;;  %v2143_v56 = vld [vmem:[#allocation5 + $0x1a8] ss:$16 sps:$4 sm:$0xff]   ;;  %v2148_v58 = vld [vmem:[#allocation5 + $0x1cc] ss:$16 sps:$4 sm:$0xff]  }
  0x7d   :  { %926 = vmatpush1.bf16.msra.mxu1 %v2082_v59  ;;  %v2224_v59 = vld [vmem:[#allocation7 + $0x80] ss:$8 sps:$4 sm:$0xff]  }
  0x7e   :  { %927 = vmatprep.subr.bf16.mxu1 %v2086_v61  ;;  %967 = vmatpush1.bf16.msra.mxu0 %v2085_v62  ;;  %v2146_v61 = vld [vmem:[#allocation5 + $0x1c8] ss:$16 sps:$4 sm:$0xff]   ;;  %v2229_v62 = vld [vmem:[#allocation7 + $0x94] ss:$8 sps:$4 sm:$0xff]  }
  0x7f   :  { %968 = vmatprep.subr.bf16.mxu0 %v2089_v63  ;;  %v2151_v63 = vld [vmem:[#allocation5 + $0x1ec] ss:$16 sps:$4 sm:$0xff]  }
  0x81   :  { %928 = vmatpush1.bf16.msra.mxu1 %v2088_v0  ;;  %v2227_v0 = vld [vmem:[#allocation7 + $0x90] ss:$8 sps:$4 sm:$0xff]  }
  0x82   :  { %929 = vmatprep.subr.bf16.mxu1 %v2092_v1  ;;  %969 = vmatpush1.bf16.msra.mxu0 %v2091_v2  ;;  %v2149_v1 = vld [vmem:[#allocation5 + $0x1e8] ss:$16 sps:$4 sm:$0xff]   ;;  %v2232_v2 = vld [vmem:[#allocation7 + $0xa4] ss:$8 sps:$4 sm:$0xff]  }
  0x83   :  { %970 = vmatprep.subr.bf16.mxu0 %v2095_v3  ;;  %v2154_v3 = vld [vmem:[#allocation5 + $0x20c] ss:$16 sps:$4 sm:$0xff]  }
  0x85   :  { %930 = vmatpush1.bf16.msra.mxu1 %v2094_v4  ;;  %v2230_v4 = vld [vmem:[#allocation7 + $0xa0] ss:$8 sps:$4 sm:$0xff]  }
  0x86   :  { %931 = vmatprep.subr.bf16.mxu1 %v2098_v5  ;;  %971 = vmatpush1.bf16.msra.mxu0 %v2097_v6  ;;  %v2152_v5 = vld [vmem:[#allocation5 + $0x208] ss:$16 sps:$4 sm:$0xff]   ;;  %v2157_v6 = vld [vmem:[#allocation5 + $0x22c] ss:$16 sps:$4 sm:$0xff]  }
  0x87   :  { %972 = vmatprep.subr.bf16.mxu0 %v2101_v7  ;;  %v2235_v7 = vld [vmem:[#allocation7 + $0xb4] ss:$8 sps:$4 sm:$0xff]  }
  0x89   :  { %932 = vmatpush1.bf16.msra.mxu1 %v2100_v8  ;;  %v2233_v8 = vld [vmem:[#allocation7 + $0xb0] ss:$8 sps:$4 sm:$0xff]  }
  0x8a   :  { %983 = vmatprep.subr.bf16.mxu1 %v2106_v10  ;;  %973 = vmatpush1.bf16.msra.mxu0 %v2103_v11  ;;  %v2155_v10 = vld [vmem:[#allocation5 + $0x228] ss:$16 sps:$4 sm:$0xff]   ;;  %v2238_v11 = vld [vmem:[#allocation7 + $0xc4] ss:$8 sps:$4 sm:$0xff]  }
  0x8b   :  { %1469 = vmatprep.subr.bf16.mxu0 %v2202_v27  ;;  %v2247_v27 = vld [vmem:[#allocation7 + $0xf4] ss:$8 sps:$4 sm:$0xff]  }
  0x8c   :  { %934 = vmatmul.mubr.bf16.vlgmr.msra.gmra.mrb[0].mxu1 %v2536_v9 }
  0x8d   :  { %984 = vmatpush1.bf16.msra.mxu1 %v2104_v12  ;;  %1015 = vmatprep.mubr.bf16.mxu1 %v254_v57  ;;  %v2226_v57 = vld [vmem:[#allocation7 + $0x84] ss:$8 sps:$4 sm:$0xff]  }
  0x8e   :  { %975 = vmatmul.mubr.bf16.vlgmr.msra.gmra.mrb[0].mxu0 %v2540_v13  ;;  %985 = vmatprep.subr.bf16.mxu1 %v2109_v14  ;;  %v2160_v12 = vld [vmem:[#allocation5 + $0x24c] ss:$16 sps:$4 sm:$0xff]   ;;  %v2236_v14 = vld [vmem:[#allocation7 + $0xc0] ss:$8 sps:$4 sm:$0xff]  }
  0x8f   :  { %1470 = vmatpush1.bf16.msra.mxu0 %v2200_v26  ;;  %v2175_v26 = vld [vmem:[#allocation5 + $0x2ec] ss:$16 sps:$4 sm:$0xff]  }
  0x90   :  { %1471 = vmatprep.subr.bf16.mxu0 %v2205_v29  ;;  %v2245_v29 = vld [vmem:[#allocation7 + $0xf0] ss:$8 sps:$4 sm:$0xff]  }
  0x91   :  { %986 = vmatpush1.bf16.msra.mxu1 %v2107_v15  ;;  %v2158_v15 = vld [vmem:[#allocation5 + $0x248] ss:$16 sps:$4 sm:$0xff]  }
  0x92   :  { %987 = vmatprep.subr.bf16.mxu1 %v2112_v16  ;;  %v2241_v16 = vld [vmem:[#allocation7 + $0xd4] ss:$8 sps:$4 sm:$0xff]  }
  0x93   :  { %1472 = vmatpush1.bf16.msra.mxu0 %v2203_v31  ;;  %v2176_v31 = vld [vmem:[#allocation5 + $0x308] ss:$16 sps:$4 sm:$0xff]  }
  0x94   :  { %1473 = vmatprep.subr.bf16.mxu0 %v2208_v32  ;;  %v2181_v32 = vld [vmem:[#allocation5 + $0x32c] ss:$16 sps:$4 sm:$0xff]  }
  0x95   :  { %988 = vmatpush1.bf16.msra.mxu1 %v2110_v17  ;;  %v2163_v17 = vld [vmem:[#allocation5 + $0x26c] ss:$16 sps:$4 sm:$0xff]  }
  0x96   :  { %989 = vmatprep.subr.bf16.mxu1 %v2115_v18  ;;  %v2161_v18 = vld [vmem:[#allocation5 + $0x268] ss:$16 sps:$4 sm:$0xff]  }
  0x97   :  { %1474 = vmatpush1.bf16.msra.mxu0 %v2206_v35  ;;  %v2184_v35 = vld [vmem:[#allocation5 + $0x34c] ss:$16 sps:$4 sm:$0xff]  }
  0x98   :  { %1475 = vmatprep.subr.bf16.mxu0 %v2211_v36  ;;  %v2182_v36 = vld [vmem:[#allocation5 + $0x348] ss:$16 sps:$4 sm:$0xff]  }
  0x99   :  { %990 = vmatpush1.bf16.msra.mxu1 %v2113_v19  ;;  %v2166_v19 = vld [vmem:[#allocation5 + $0x28c] ss:$16 sps:$4 sm:$0xff]  }
  0x9a   :  { %991 = vmatprep.subr.bf16.mxu1 %v2118_v20  ;;  %v2169_v20 = vld [vmem:[#allocation5 + $0x2ac] ss:$16 sps:$4 sm:$0xff]  }
  0x9b   :  { %1476 = vmatpush1.bf16.msra.mxu0 %v2209_v39  ;;  %v2190_v39 = vld [vmem:[#allocation5 + $0x38c] ss:$16 sps:$4 sm:$0xff]  }
  0x9c   :  { %1477 = vmatprep.subr.bf16.mxu0 %v2214_v40  ;;  %v2188_v40 = vld [vmem:[#allocation5 + $0x388] ss:$16 sps:$4 sm:$0xff]  }
  0x9d   :  { %992 = vmatpush1.bf16.msra.mxu1 %v2116_v21  ;;  %v2167_v21 = vld [vmem:[#allocation5 + $0x2a8] ss:$16 sps:$4 sm:$0xff]  }
  0x9e   :  { %993 = vmatprep.subr.bf16.mxu1 %v2121_v22  ;;  %v2172_v22 = vld [vmem:[#allocation5 + $0x2cc] ss:$16 sps:$4 sm:$0xff]  }
  0x9f   :  { %1478 = vmatpush1.bf16.msra.mxu0 %v2212_v43  ;;  %v2196_v43 = vld [vmem:[#allocation5 + $0x3cc] ss:$16 sps:$4 sm:$0xff]  }
  0xa0   :  { %1479 = vmatprep.subr.bf16.mxu0 %v2217_v45  ;;  %v2194_v45 = vld [vmem:[#allocation5 + $0x3c8] ss:$16 sps:$4 sm:$0xff]  }
  0xa1   :  { %994 = vmatpush1.bf16.msra.mxu1 %v2119_v23  ;;  %v2244_v23 = vld [vmem:[#allocation7 + $0xe4] ss:$8 sps:$4 sm:$0xff]  }
  0xa2   :  { %995 = vmatprep.subr.bf16.mxu1 %v2124_v24  ;;  %v2170_v24 = vld [vmem:[#allocation5 + $0x2c8] ss:$16 sps:$4 sm:$0xff]  }
  0xa3   :  { %1480 = vmatpush1.bf16.msra.mxu0 %v2215_v47  ;;  %v2197_v47 = vld [vmem:[#allocation5 + $0x3e8] ss:$16 sps:$4 sm:$0xff]  }
  0xa4   :  { %1481 = vmatprep.subr.bf16.mxu0 %v2220_v49  ;;  %v2551_v49 = vld [vmem:[%s2588_s2] sm:$0xf] }
  0xa5   :  { %996 = vmatpush1.bf16.msra.mxu1 %v2122_v25  ;;  %v2242_v25 = vld [vmem:[#allocation7 + $0xe0] ss:$8 sps:$4 sm:$0xff]  }
  0xa6   :  { %997 = vmatprep.subr.bf16.mxu1 %v2127_v28  ;;  %v2173_v28 = vld [vmem:[#allocation5 + $0x2e8] ss:$16 sps:$4 sm:$0xff]  }
  0xa7   :  { %1482 = vmatpush1.bf16.msra.mxu0 %v2218_v51 }
  0xa8   :  { %1483 = vmatprep.subr.bf16.mxu0 %v2223_v53 }
  0xa9   :  { %998 = vmatpush1.bf16.msra.mxu1 %v2125_v30  ;;  %v2178_v30 = vld [vmem:[#allocation5 + $0x30c] ss:$16 sps:$4 sm:$0xff]  }
  0xaa   :  { %999 = vmatprep.subr.bf16.mxu1 %v2130_v33  ;;  %v2250_v33 = vld [vmem:[#allocation7 + $0x104] ss:$8 sps:$4 sm:$0xff]  }
  0xab   :  { %1484 = vmatpush1.bf16.msra.mxu0 %v2221_v55 }
  0xac   :  { %1485 = vmatprep.subr.bf16.mxu0 %v2226_v57 }
  0xad   :  { %1000 = vmatpush1.bf16.msra.mxu1 %v2128_v34  ;;  %v2179_v34 = vld [vmem:[#allocation5 + $0x328] ss:$16 sps:$4 sm:$0xff]  }
  0xae   :  { %1001 = vmatprep.subr.bf16.mxu1 %v2133_v37  ;;  %v2187_v37 = vld [vmem:[#allocation5 + $0x36c] ss:$16 sps:$4 sm:$0xff]  }
  0xaf   :  { %1486 = vmatpush1.bf16.msra.mxu0 %v2224_v59 }
  0xb0   :  { %1487 = vmatprep.subr.bf16.mxu0 %v2229_v62 }
  0xb1   :  { %1002 = vmatpush1.bf16.msra.mxu1 %v2131_v38  ;;  %v2185_v38 = vld [vmem:[#allocation5 + $0x368] ss:$16 sps:$4 sm:$0xff]  }
  0xb2   :  { %1003 = vmatprep.subr.bf16.mxu1 %v2136_v41  ;;  %v2193_v41 = vld [vmem:[#allocation5 + $0x3ac] ss:$16 sps:$4 sm:$0xff]  }
  0xb3   :  { %1488 = vmatpush1.bf16.msra.mxu0 %v2227_v0 }
  0xb4   :  { %1489 = vmatprep.subr.bf16.mxu0 %v2232_v2 }
  0xb5   :  { %1004 = vmatpush1.bf16.msra.mxu1 %v2134_v42  ;;  %v2191_v42 = vld [vmem:[#allocation5 + $0x3a8] ss:$16 sps:$4 sm:$0xff]  }
  0xb6   :  { %1005 = vmatprep.subr.bf16.mxu1 %v2139_v46  ;;  %v2199_v46 = vld [vmem:[#allocation5 + $0x3ec] ss:$16 sps:$4 sm:$0xff]  }
  0xb7   :  { %1490 = vmatpush1.bf16.msra.mxu0 %v2230_v4 }
  0xb8   :  { %1491 = vmatprep.subr.bf16.mxu0 %v2235_v7  ;;  %v2296_v7 = vld [vmem:[#allocation8 + $0x40] sm:$0xff]  }
  0xb9   :  { %1006 = vmatpush1.bf16.msra.mxu1 %v2137_v48  ;;  %v214_v48 = vsub.s32 0, %v2530_v44 }
  0xba   :  { %1007 = vmatprep.subr.bf16.mxu1 %v2142_v50  ;;  %v218_v50 = vsub.s32 1, %v2530_v44 }
  0xbb   :  { %1492 = vmatpush1.bf16.msra.mxu0 %v2233_v8  ;;  %v215_v51 = vrot.slane %v2551_v49, %v214_v48  ;;  %v2297_v8 = vld [vmem:[#allocation8] sm:$0xff]  }
  0xbc   :  { %1493 = vmatprep.subr.bf16.mxu0 %v2238_v11  ;;  %v2251_v11 = vld [vmem:[#allocation7 + $0x110] ss:$8 sps:$4 sm:$0xff]  }
  0xbd   :  { %1008 = vmatpush1.bf16.msra.mxu1 %v2140_v52  ;;  %v219_v52 = vrot.slane %v2551_v49, %v218_v50 }
  0xbe   :  { %1009 = vmatprep.subr.bf16.mxu1 %v2145_v54 }
  0xbf   :  { %1494 = vmatpush1.bf16.msra.mxu0 %v2236_v14  ;;  %v2256_v14 = vld [vmem:[#allocation7 + $0x124] ss:$8 sps:$4 sm:$0xff]  }
  0xc0   :  { %1495 = vmatprep.subr.bf16.mxu0 %v2241_v16  ;;  %v2254_v16 = vld [vmem:[#allocation7 + $0x120] ss:$8 sps:$4 sm:$0xff]  }
  0xc1   :  { %1010 = vmatpush1.bf16.msra.mxu1 %v2143_v56 }
  0xc2   :  { %1011 = vmatprep.subr.bf16.mxu1 %v2148_v58 }
  0xc5   :  { %1012 = vmatpush1.bf16.msra.mxu1 %v2146_v61 }
  0xc6   :  { %1013 = vmatprep.subr.bf16.mxu1 %v2151_v63 }
  0xc9   :  { %1014 = vmatpush1.bf16.msra.mxu1 %v2149_v1 }
  0xca   :  { %1024 = vmatprep.subr.bf16.mxu1 %v2154_v3 }
  0xcc   :  { %1016 = vmatmul.mubr.bf16.vlgmr.msra.gmra.mrb[4].mxu1 %v2536_v9  ;;  %v2239_v9 = vld [vmem:[#allocation7 + $0xd0] ss:$8 sps:$4 sm:$0xff]  }
  0xcd   :  { %1025 = vmatpush1.bf16.msra.mxu1 %v2152_v5  ;;  %1056 = vmatprep.mubr.bf16.mxu1 %v2533_v60  ;;  %v2164_v60 = vld [vmem:[#allocation5 + $0x288] ss:$16 sps:$4 sm:$0xff]  }
  0xce   :  { %1026 = vmatprep.subr.bf16.mxu1 %v2157_v6  ;;  %1496 = vmatpush1.bf16.msra.mxu0 %v2239_v9  ;;  %v2248_v5 = vld [vmem:[#allocation7 + $0x100] ss:$8 sps:$4 sm:$0xff]   ;;  %v2253_v6 = vld [vmem:[#allocation7 + $0x114] ss:$8 sps:$4 sm:$0xff]  }
  0xcf   :  { %1497 = vmatprep.subr.bf16.mxu0 %v2244_v23  ;;  %v2259_v9 = vld [vmem:[#allocation7 + $0x134] ss:$8 sps:$4 sm:$0xff]   ;;  %v2305_v23 = vld [vmem:[#allocation8 + $0x20] sm:$0xff]  }
  0xd1   :  { %1027 = vmatpush1.bf16.msra.mxu1 %v2155_v10  ;;  %v2298_v10 = vld [vmem:[#allocation8 + $0x48] sm:$0xff]  }
  0xd2   :  { %1028 = vmatprep.subr.bf16.mxu1 %v2160_v12  ;;  %1498 = vmatpush1.bf16.msra.mxu0 %v2242_v25  ;;  %v2299_v12 = vld [vmem:[#allocation8 + $0x8] sm:$0xff]  }
  0xd3   :  { %1499 = vmatprep.subr.bf16.mxu0 %v2247_v27  ;;  %v2306_v25 = vld [vmem:[#allocation8 + $0x68] sm:$0xff]  }
  0xd4   :  { %v2307_v27 = vld [vmem:[#allocation8 + $0x28] sm:$0xff]  }
  0xd5   :  { %1029 = vmatpush1.bf16.msra.mxu1 %v2158_v15  ;;  %v2300_v15 = vld [vmem:[#allocation8 + $0x50] sm:$0xff]  }
  0xd6   :  { %1030 = vmatprep.subr.bf16.mxu1 %v2163_v17  ;;  %1500 = vmatpush1.bf16.msra.mxu0 %v2245_v29  ;;  %v2301_v17 = vld [vmem:[#allocation8 + $0x10] sm:$0xff]   ;;  %v2266_v29 = vld [vmem:[#allocation7 + $0x160] ss:$8 sps:$4 sm:$0xff]  }
  0xd7   :  { %1510 = vmatprep.subr.bf16.mxu0 %v2250_v33  ;;  %v2272_v33 = vld [vmem:[#allocation7 + $0x180] ss:$8 sps:$4 sm:$0xff]  }
  0xd9   :  { %1031 = vmatpush1.bf16.msra.mxu1 %v2161_v18  ;;  %v2302_v18 = vld [vmem:[#allocation8 + $0x58] sm:$0xff]  }
  0xda   :  { %1032 = vmatprep.subr.bf16.mxu1 %v2166_v19  ;;  %v2257_v19 = vld [vmem:[#allocation7 + $0x130] ss:$8 sps:$4 sm:$0xff]  }
  0xdd   :  { %1033 = vmatpush1.bf16.msra.mxu1 %v2164_v60  ;;  %v2303_v60 = vld [vmem:[#allocation8 + $0x18] sm:$0xff]  }
  0xde   :  { %1034 = vmatprep.subr.bf16.mxu1 %v2169_v20  ;;  %v2262_v20 = vld [vmem:[#allocation7 + $0x144] ss:$8 sps:$4 sm:$0xff]  }
  0xe1   :  { %1035 = vmatpush1.bf16.msra.mxu1 %v2167_v21  ;;  %v2304_v21 = vld [vmem:[#allocation8 + $0x60] sm:$0xff]  }
  0xe2   :  { %1036 = vmatprep.subr.bf16.mxu1 %v2172_v22  ;;  %v2260_v22 = vld [vmem:[#allocation7 + $0x140] ss:$8 sps:$4 sm:$0xff]  }
  0xe5   :  { %1037 = vmatpush1.bf16.msra.mxu1 %v2170_v24  ;;  %v2265_v24 = vld [vmem:[#allocation7 + $0x154] ss:$8 sps:$4 sm:$0xff]  }
  0xe6   :  { %1038 = vmatprep.subr.bf16.mxu1 %v2175_v26  ;;  %v2263_v26 = vld [vmem:[#allocation7 + $0x150] ss:$8 sps:$4 sm:$0xff]  }
  0xe9   :  { %1039 = vmatpush1.bf16.msra.mxu1 %v2173_v28  ;;  %v2268_v28 = vld [vmem:[#allocation7 + $0x164] ss:$8 sps:$4 sm:$0xff]  }
  0xea   :  { %1040 = vmatprep.subr.bf16.mxu1 %v2178_v30  ;;  %v2271_v30 = vld [vmem:[#allocation7 + $0x174] ss:$8 sps:$4 sm:$0xff]  }
  0xed   :  { %1041 = vmatpush1.bf16.msra.mxu1 %v2176_v31  ;;  %v2269_v31 = vld [vmem:[#allocation7 + $0x170] ss:$8 sps:$4 sm:$0xff]  }
  0xee   :  { %1042 = vmatprep.subr.bf16.mxu1 %v2181_v32  ;;  %v2274_v32 = vld [vmem:[#allocation7 + $0x184] ss:$8 sps:$4 sm:$0xff]  }
  0xf1   :  { %1043 = vmatpush1.bf16.msra.mxu1 %v2179_v34  ;;  %v2277_v34 = vld [vmem:[#allocation7 + $0x194] ss:$8 sps:$4 sm:$0xff]  }
  0xf2   :  { %1044 = vmatprep.subr.bf16.mxu1 %v2184_v35  ;;  %v2275_v35 = vld [vmem:[#allocation7 + $0x190] ss:$8 sps:$4 sm:$0xff]  }
  0xf5   :  { %1045 = vmatpush1.bf16.msra.mxu1 %v2182_v36  ;;  %v2280_v36 = vld [vmem:[#allocation7 + $0x1a4] ss:$8 sps:$4 sm:$0xff]  }
  0xf6   :  { %1046 = vmatprep.subr.bf16.mxu1 %v2187_v37  ;;  %v2278_v37 = vld [vmem:[#allocation7 + $0x1a0] ss:$8 sps:$4 sm:$0xff]  }
  0xf9   :  { %1047 = vmatpush1.bf16.msra.mxu1 %v2185_v38  ;;  %v2283_v38 = vld [vmem:[#allocation7 + $0x1b4] ss:$8 sps:$4 sm:$0xff]  }
  0xfa   :  { %1048 = vmatprep.subr.bf16.mxu1 %v2190_v39  ;;  %v2281_v39 = vld [vmem:[#allocation7 + $0x1b0] ss:$8 sps:$4 sm:$0xff]  }
  0xfd   :  { %1049 = vmatpush1.bf16.msra.mxu1 %v2188_v40  ;;  %v2286_v40 = vld [vmem:[#allocation7 + $0x1c4] ss:$8 sps:$4 sm:$0xff]  }
  0xfe   :  { %1050 = vmatprep.subr.bf16.mxu1 %v2193_v41  ;;  %v2284_v41 = vld [vmem:[#allocation7 + $0x1c0] ss:$8 sps:$4 sm:$0xff]  }
 0x101   :  { %1051 = vmatpush1.bf16.msra.mxu1 %v2191_v42  ;;  %v2289_v42 = vld [vmem:[#allocation7 + $0x1d4] ss:$8 sps:$4 sm:$0xff]  }
 0x102   :  { %1052 = vmatprep.subr.bf16.mxu1 %v2196_v43  ;;  %v2287_v43 = vld [vmem:[#allocation7 + $0x1d0] ss:$8 sps:$4 sm:$0xff]  }
 0x105   :  { %1053 = vmatpush1.bf16.msra.mxu1 %v2194_v45  ;;  %v2292_v45 = vld [vmem:[#allocation7 + $0x1e4] ss:$8 sps:$4 sm:$0xff]  }
 0x106   :  { %1054 = vmatprep.subr.bf16.mxu1 %v2199_v46  ;;  %v2290_v46 = vld [vmem:[#allocation7 + $0x1e0] ss:$8 sps:$4 sm:$0xff]  }
 0x109   :  { %1055 = vmatpush1.bf16.msra.mxu1 %v2197_v47  ;;  %v2295_v47 = vld [vmem:[#allocation7 + $0x1f4] ss:$8 sps:$4 sm:$0xff]  }
 0x10a   :  { %1958 = vmatprep.subr.bf16.mxu1 %v2296_v7 }
 0x10c   :  { %1057 = vmatmul.mubr.bf16.vlgmr.msra.gmra.mrb[4].mxu1 %v2540_v13 }
 0x10d   :  { %1959 = vmatpush3.bf16.msra.mxu1 %v2297_v8 }
 0x10e   :  { %1960 = vmatprep.subr.bf16.mxu1 %v2298_v10 }
 0x111   :  { %1961 = vmatpush3.bf16.msra.mxu1 %v2299_v12 }
 0x112   :  { %1962 = vmatprep.subr.bf16.mxu1 %v2300_v15 }
 0x115   :  { %1963 = vmatpush3.bf16.msra.mxu1 %v2301_v17 }
 0x116   :  { %1964 = vmatprep.subr.bf16.mxu1 %v2302_v18 }
 0x119   :  { %1965 = vmatpush3.bf16.msra.mxu1 %v2303_v60 }
 0x11a   :  { %1966 = vmatprep.subr.bf16.mxu1 %v2304_v21 }
 0x11d   :  { %1967 = vmatpush3.bf16.msra.mxu1 %v2305_v23 }
 0x11e   :  { %1968 = vmatprep.subr.bf16.mxu1 %v2306_v25 }
 0x121   :  { %1969 = vmatpush3.bf16.msra.mxu1 %v2307_v27 }
 0x15f   :  { %v935_v53 = vpop.f32.mrb[0].mxu1 }
 0x160   :  { %v936_v54 = vadd.f32 %v935_v53, %v215_v51  ;;  %v937_v13 = vpop.f32.mrb[1].mxu1  ;;  %v2293_v51 = vld [vmem:[#allocation7 + $0x1f0] ss:$8 sps:$4 sm:$0xff]   ;;  %v226_v53 = vsub.s32 3, %v2530_v44 }
 0x161   :  { %v938_v55 = vadd.f32 %v937_v13, %v219_v52  ;;  %v939_v56 = vpop.f32.mrb[2].mxu1  ;;  %v976_v57 = vpop.f32.mrb[0].mxu0  ;;  %v222_v52 = vsub.s32 2, %v2530_v44 }
 0x162   :  { %v977_v58 = vadd.f32 %v976_v57, %v936_v54  ;;  %v940_v59 = vpop.f32.mrb[3].mxu1  ;;  %v978_v61 = vpop.f32.mrb[1].mxu0  ;;  %v227_v13 = vrot.slane %v2551_v49, %v226_v53 }
 0x163   :  { %v979_v62 = vadd.f32 %v978_v61, %v938_v55  ;;  %v980_v63 = vpop.f32.mrb[2].mxu0  ;;  %v223_v54 = vrot.slane %v2551_v49, %v222_v52  ;;  %v1137_v49 = vld [vmem:[%s2590_s4] sm:$0x3] }
 0x164   :  { %v1065_v0 = vmax.f32 %v977_v58, 0.0  ;;  %v981_v1 = vpop.f32.mrb[3].mxu0  ;;  %v1146_v7 = vrot.slane %v1137_v49, %v218_v50 }
 0x165   :  { %v1066_v2 = vmax.f32 %v979_v62, 0.0 }
 0x166   :  { %v1069_v3 = vpack.c.bf16 %v1065_v0, %v1065_v0 }
 0x167   :  { %v1070_v4 = vpack.c.bf16 %v1066_v2, %v1066_v2  ;;  %v2308_v2 = vld [vmem:[#allocation8 + $0x70] sm:$0xff]  }
 0x168   :  { %1970 = vmatprep.subr.bf16.mxu1 %v2308_v2 }
 0x169   :  { %1501 = vmatprep.mubr.bf16.mxu0 %v1070_v4  ;;  %v2310_v4 = vld [vmem:[#allocation8 + $0x78] sm:$0xff]  }
 0x16a   :  { %1502 = vmatmul.mubr.bf16.vlgmr.msra.gmra.mrb[4].mxu0 %v1069_v3  ;;  %v2309_v3 = vld [vmem:[#allocation8 + $0x30] sm:$0xff]  }
 0x16b   :  { %1511 = vmatpush1.bf16.msra.mxu0 %v2248_v5  ;;  %1971 = vmatpush3.bf16.msra.mxu1 %v2309_v3  ;;  %v2311_v5 = vld [vmem:[#allocation8 + $0x38] sm:$0xff]  }
 0x16c   :  { %1512 = vmatprep.subr.bf16.mxu0 %v2253_v6  ;;  %1972 = vmatprep.subr.bf16.mxu1 %v2310_v4  ;;  %v1142_v6 = vrot.slane %v1137_v49, %v214_v48  ;;  %v1941_v48 = vld [vmem:[%s2592_s6] ss:$0 sm:$0xff] }
 0x16f   :  { %1513 = vmatpush1.bf16.msra.mxu0 %v2251_v11  ;;  %1973 = vmatpush3.bf16.msra.mxu1 %v2311_v5 }
 0x170   :  { %1514 = vmatprep.subr.bf16.mxu0 %v2256_v14 }
 0x173   :  { %1515 = vmatpush1.bf16.msra.mxu0 %v2254_v16 }
 0x174   :  { %1516 = vmatprep.subr.bf16.mxu0 %v2259_v9 }
 0x177   :  { %1517 = vmatpush1.bf16.msra.mxu0 %v2257_v19 }
 0x178   :  { %1518 = vmatprep.subr.bf16.mxu0 %v2262_v20 }
 0x17b   :  { %1519 = vmatpush1.bf16.msra.mxu0 %v2260_v22 }
 0x17c   :  { %1520 = vmatprep.subr.bf16.mxu0 %v2265_v24 }
 0x17f   :  { %1521 = vmatpush1.bf16.msra.mxu0 %v2263_v26 }
 0x180   :  { %1522 = vmatprep.subr.bf16.mxu0 %v2268_v28 }
 0x183   :  { %1523 = vmatpush1.bf16.msra.mxu0 %v2266_v29 }
 0x184   :  { %1524 = vmatprep.subr.bf16.mxu0 %v2271_v30 }
 0x187   :  { %1525 = vmatpush1.bf16.msra.mxu0 %v2269_v31 }
 0x188   :  { %1526 = vmatprep.subr.bf16.mxu0 %v2274_v32 }
 0x18b   :  { %1527 = vmatpush1.bf16.msra.mxu0 %v2272_v33 }
 0x18c   :  { %1528 = vmatprep.subr.bf16.mxu0 %v2277_v34 }
 0x18f   :  { %1529 = vmatpush1.bf16.msra.mxu0 %v2275_v35 }
 0x190   :  { %1530 = vmatprep.subr.bf16.mxu0 %v2280_v36 }
 0x193   :  { %1531 = vmatpush1.bf16.msra.mxu0 %v2278_v37 }
 0x194   :  { %1532 = vmatprep.subr.bf16.mxu0 %v2283_v38 }
 0x197   :  { %1533 = vmatpush1.bf16.msra.mxu0 %v2281_v39 }
 0x198   :  { %1534 = vmatprep.subr.bf16.mxu0 %v2286_v40 }
 0x19b   :  { %1535 = vmatpush1.bf16.msra.mxu0 %v2284_v41 }
 0x19c   :  { %1536 = vmatprep.subr.bf16.mxu0 %v2289_v42 }
 0x19f   :  { %1537 = vmatpush1.bf16.msra.mxu0 %v2287_v43 }
 0x1a0   :  { %1538 = vmatprep.subr.bf16.mxu0 %v2292_v45 }
 0x1a3   :  { %1539 = vmatpush1.bf16.msra.mxu0 %v2290_v46 }
 0x1a4   :  { %1540 = vmatprep.subr.bf16.mxu0 %v2295_v47 }
 0x1a7   :  { %1541 = vmatpush1.bf16.msra.mxu0 %v2293_v51 }
 0x1df   :  { %v1058_v55 = vpop.f32.mrb[4].mxu1 }
 0x1e0   :  { %v1984_v56 = vadd.f32 %v1058_v55, %v223_v54  ;;  %v1060_v57 = vpop.f32.mrb[5].mxu1 }
 0x1e1   :  { %v1985_v58 = vadd.f32 %v1060_v57, %v227_v13  ;;  %v1062_v59 = vpop.f32.mrb[6].mxu1 }
 0x1e2   :  { %v1067_v61 = vmax.f32 %v1984_v56, 0.0  ;;  %v1063_v62 = vpop.f32.mrb[7].mxu1 }
 0x1e3   :  { %v1068_v63 = vmax.f32 %v1985_v58, 0.0 }
 0x1e4   :  { %v1071_v1 = vpack.c.bf16 %v1067_v61, %v1067_v61 }
 0x1e5   :  { %v1072_v0 = vpack.c.bf16 %v1068_v63, %v1068_v63 }
 0x1e7   :  { %1542 = vmatprep.mubr.bf16.mxu0 %v1072_v0 }
 0x1e8   :  { %1543 = vmatmul.mubr.bf16.vlgmr.msra.gmra.mrb[4].mxu0 %v1071_v1 }
 0x2bb   :  { %v1544_v8 = vpop.f32.mrb[4].mxu0 }
 0x2bc   :  { %v1986_v10 = vadd.f32 %v1544_v8, %v1142_v6  ;;  %v1546_v11 = vpop.f32.mrb[5].mxu0 }
 0x2bd   :  { %v1987_v12 = vadd.f32 %v1546_v11, %v1146_v7  ;;  %v1548_v14 = vpop.f32.mrb[6].mxu0 }
 0x2be   :  { %v1551_v15 = vmax.f32 %v1986_v10, 0.0  ;;  %v1549_v16 = vpop.f32.mrb[7].mxu0 }
 0x2bf   :  { %v1552_v17 = vmax.f32 %v1987_v12, 0.0 }
 0x2c0   :  { %v1553_v18 = vpack.c.bf16 %v1551_v15, %v1551_v15 }
 0x2c1   :  { %v1554_v9 = vpack.c.bf16 %v1552_v17, %v1552_v17 }
 0x2c3   :  { %1722 = vmatprep.mubr.bf16.mxu1 %v1554_v9 }
 0x2c4   :  { %1723 = vmatmul.mubr.bf16.vlgmr.msra.gmra.mrb[8].mxu1 %v1553_v18 }
 0x397   :  { %v1974_v19 = vpop.f32.mrb[8].mxu1 }
 0x398   :  { %v1975_v60 = vpop.f32.mrb[9].mxu1 }
 0x399   :  { %v1976_v44 = vadd.f32 %v1975_v60, %v1974_v19  ;;  %v1977_v50 = vpop.f32.mrb[10].mxu1 }
 0x39a   :  { %v1978_v20 = vpop.f32.mrb[11].mxu1 }
 0x39b   :  { %v1725_v21 = vadd.f32 %v1976_v44, %v1941_v48 }
 0x39d   :  { %1730 = vst [vmem:[#allocation10] sm:$0x3] %v1725_v21 }
 0x39e   :  { %2411 = shalt.err (!%p2408_p8)
}
 0x39f   :  { %s2412_s6 = scalar_lea.hbm %s2593_s7, 32 }
 0x3a0   :  { %p2413_p9 = scmp.ne.s32.totalorder %s2593_s7, %s2412_s6  ;;  %p2416_p10 = scmp.lt.u32.totalorder %s2412_s6, %s2593_s7 }
 0x3a2   :  { %p2418_p11 = pnand %p2416_p10, %p2413_p9 }
 0x3a4   :  { %2421 = shalt.err (!%p2418_p11)
}
 0x3a5   :  { %1740 = dma.vmem_to_hbm [thread:$0]  %s1738_s9, 32, %s2593_s7, [#allocation4]  }
 0x3a6   :  { %2428 = dma.done.wait [#allocation4], 32  }
 0x3a7   :  { %2429 = vsyncadd [#allocation4], 4294967264 }
 0x3a8   :  { %1744 = vsyncpa [#allocation3], 1 }
 0x3a9   :  { %1745 = vsyncpa [#allocation6], 1 }
 0x3aa   :  { %1746 = vsyncpa [#allocation9], 1 }
 0x3ab   :  { %1747 = vsyncpa [#allocation4], 1 }

</bundles_post_ra>
